<compile_context>
chip_gen: v7x
topology: tpu7x:2x2x1
jax: 0.10.0
libtpu: 0.0.40
codegen_flags: <defaults>
</compile_context>

<pallas_src>
import jax
import jax.numpy as jnp
from jax.experimental import pallas as pl
from jax.experimental.pallas import tpu as pltpu

LN_EPS = 1e-5  # nn.LayerNorm default eps


def head_kernel(x_ref, gw_ref, scal_ref, out_ref):
    """Fused CLS LayerNorm + Linear(D, 1) on a (TB, D) tile, lane-dense output.

    x_ref    : (TB, D)    CLS tokens (bf16/f32; upcast to f32 here)
    gw_ref   : (1, D)     precomputed gamma * fc_weight (f32, grid-resident)
    scal_ref : (2,) SMEM  [sum(gamma*w), dot(beta, w) + fc_bias]
    out_ref  : (1, 1, TB) logits for this batch tile (one lane-dense row)
    """
    tb, d = x_ref.shape
    x = x_ref[...].astype(jnp.float32)        # (TB, D)
    gw = gw_ref[...]                          # (1, D), broadcasts over rows

    # Single elementwise traversal of x: three lane reductions, no centered temp.
    inv_d = 1.0 / d
    mean = jnp.sum(x, axis=-1, keepdims=True) * inv_d          # (TB, 1)
    ex2 = jnp.sum(x * x, axis=-1, keepdims=True) * inv_d       # E[x^2]
    sum_xgw = jnp.sum(x * gw, axis=-1, keepdims=True)          # sum(x * gamma * w)

    # One-pass biased variance (matches nn.LayerNorm); clamp guards cancellation.
    var = jnp.maximum(ex2 - mean * mean, 0.0)
    inv = jax.lax.rsqrt(var + LN_EPS)                           # (TB, 1)

    # Dropout(p=0.2) is identity in eval mode.
    # logits = inv * sum((x - mean) * gamma * w) + (beta.w + b)
    #        = inv * (sum(x*gw) - mean * sum(gw)) + c
    s = sum_xgw - mean * scal_ref[0]
    logits = inv * s + scal_ref[1]                              # (TB, 1)

    # Lane-dense store: (TB, 1) -> (1, TB) via XLU transpose (slot idle here),
    # avoiding TB masked 1-wide partial stores per grid step.
    out_ref[...] = jnp.transpose(logits)[None].astype(out_ref.dtype)


def _round_up(x, m):
    return ((x + m - 1) // m) * m


def _choose_tb(batch):
    """Batch-tile rows per grid step.

    * batch <= 8 : one block (rows < 8 cannot legally tile the sublane dim)
    * moderate   : split into >= 2 blocks so the "parallel" axis can shard
                   across v7x's two TensorCores
    * large      : cap at 2048 rows (amortizes the ~0.35 us/step overhead while
                   keeping the 3-buffered bf16 input + f32 temps under the
                   32 MiB scoped-VMEM default on v5e/v6e/v7x)
    """
    if batch <= 8:
        return batch
    return min(2048, _round_up(pl.cdiv(batch, 2), 8))


def classifier_head(last_hidden_state, gamma, beta, w, b, *, tb=None):
    """Pallas classification head; CLS slice fused into the input BlockSpec."""
    B, S, D = last_hidden_state.shape
    if tb is None:
        tb = _choose_tb(B)
    grid_n = pl.cdiv(B, tb)

    # Free, contiguous view: (B, S, D) -> (B, S*D). The CLS token of row i is
    # columns [0, D), so a (tb, D) block at column-block 0 DMAs exactly the
    # seq-0 rows -- CLS extraction happens inside the kernel's input DMA.
    hs2 = last_hidden_state.reshape(B, S * D)

    # Fold LayerNorm affine + fc bias into the final reduction (done once here).
    gamma32 = gamma.astype(jnp.float32)
    beta32 = beta.astype(jnp.float32)
    w32 = w.astype(jnp.float32)
    gw = (gamma32 * w32).reshape(1, D)                               # gamma * w
    c = jnp.dot(beta32, w32) + b.astype(jnp.float32).reshape(())
    scal = jnp.stack([jnp.sum(gw), c]).astype(jnp.float32)           # (2,) SMEM

    # 3-deep input pipelining hides the strided CLS fetch (tb short rows with an
    # S*D*itemsize row pitch) behind the tiny per-block compute; only meaningful
    # when the grid has more than one step.
    if grid_n >= 2:
        x_spec = pl.BlockSpec((tb, D), lambda i: (i, 0),
                              pipeline_mode=pl.Buffered(3))
    else:
        x_spec = pl.BlockSpec((tb, D), lambda i: (i, 0))

    itemsize = jnp.dtype(last_hidden_state.dtype).itemsize
    out = pl.pallas_call(
        head_kernel,
        out_shape=jax.ShapeDtypeStruct((grid_n, 1, tb), jnp.float32),
        grid=(grid_n,),
        in_specs=[
            x_spec,                                           # CLS rows of hs2
            pl.BlockSpec((1, D), lambda i: (0, 0)),           # gamma*w, resident
            pl.BlockSpec(memory_space=pltpu.MemorySpace.SMEM),  # [sum_gw, c]
        ],
        # Lane-dense output: one (1, tb) row per batch tile -> unmasked stores.
        out_specs=pl.BlockSpec((1, 1, tb), lambda i: (i, 0, 0)),
        compiler_params=pltpu.CompilerParams(
            # Batch tiles are independent -> shard across the 2 TCs on v7x.
            dimension_semantics=("parallel",),
        ),
        cost_estimate=pl.CostEstimate(
            flops=6 * B * D,
            transcendentals=B,
            bytes_accessed=int(B * D * itemsize + grid_n * tb * 4 + D * 4 + 8),
        ),
    )(hs2, gw, scal)

    # Rows >= B in a partial last tile are computed on unspecified padding data;
    # every row is independent, so valid rows are unaffected and the padded
    # tail is simply sliced off here (no explicit mask needed).
    return out.reshape(-1)[:B]                                 # squeeze(-1)


def reference_head(last_hidden_state, gamma, beta, w, b):
    """Pure-JAX reference of the PyTorch head (eval mode), unfolded params."""
    cls = last_hidden_state[:, 0, :].astype(jnp.float32)
    mean = jnp.mean(cls, axis=-1, keepdims=True)
    var = jnp.mean((cls - mean) ** 2, axis=-1, keepdims=True)
    h = (cls - mean) / jnp.sqrt(var + LN_EPS) * gamma.astype(jnp.float32) \
        + beta.astype(jnp.float32)
    return (h @ w.astype(jnp.float32).reshape(-1, 1)
            + b.astype(jnp.float32)).squeeze(-1)


if __name__ == "__main__":
    key = jax.random.PRNGKey(0)

    def run_case(B, S, D, tb=None):
        kh, kg, kb, kw = jax.random.split(jax.random.fold_in(key, B * 1000 + D), 4)
        # Synthetic backbone output (stand-in for AutoModel last_hidden_state),
        # fed in bf16 to halve HBM traffic; the kernel upcasts to f32 internally.
        hs = jax.random.normal(kh, (B, S, D), dtype=jnp.float32).astype(jnp.bfloat16)
        # Head parameters (shapes match nn.LayerNorm(d), nn.Linear(d, 1)),
        # perturbed from ones/zeros so the gamma/beta/bias folding is exercised.
        gamma = 1.0 + 0.1 * jax.random.normal(kg, (D,), dtype=jnp.float32)
        beta = 0.05 * jax.random.normal(kb, (D,), dtype=jnp.float32)
        w = jax.random.normal(kw, (D,), dtype=jnp.float32) / jnp.sqrt(D)
        b = jnp.full((1,), 0.1, dtype=jnp.float32)

        y = jax.block_until_ready(classifier_head(hs, gamma, beta, w, b, tb=tb))
        y_ref = reference_head(hs, gamma, beta, w, b)
        assert y.shape == (B,), y.shape
        assert jnp.allclose(y, y_ref, atol=2e-3, rtol=2e-3), (y, y_ref)

    # Single-block path: batch=2, seq=8, hidden=128 (real deberta-v3-base uses
    # hidden=768; kept small and lane-aligned here).
    run_case(B=2, S=8, D=128)
    # Multi-block path: 2 batch tiles (v7x TC sharding), partial last tile,
    # 3-deep input pipeline, lane-dense multi-tile output.
    run_case(B=44, S=8, D=256)

    print("KERNEL_OK")
</pallas_src>

<mosaic_0001>
module attributes {stable_mosaic.version = 11 : i64} {
  func.func @head_kernel(%arg0: i32, %arg1: memref<2x128xbf16, #tpu.memory_space<vmem>>, %arg2: memref<1x128xf32, #tpu.memory_space<vmem>>, %arg3: memref<2xf32, #tpu.memory_space<smem>>, %arg4: memref<1x1x2xf32, #tpu.memory_space<vmem>>) attributes {dimension_semantics = [#tpu.dimension_semantics<parallel>], iteration_bounds = array<i64: 1>, scalar_prefetch = 0 : i64, scratch_operands = 0 : i64, tpu.core_type = #tpu.core_type<tc>, window_params = [{transform_indices = @transform_0, window_bounds = array<i64: 2, 128>}, {pipeline_mode = #tpu.pipeline_mode<synchronous>, transform_indices = @transform_1, window_bounds = array<i64: 1, 128>}, {transform_indices = @transform_2, window_bounds = array<i64: 2>}, {transform_indices = @transform_3, window_bounds = array<i64: 1, 1, 2>}]} {
    %c0 = arith.constant 0 : index
    %c0_0 = arith.constant 0 : index
    %0 = vector.load %arg1[%c0, %c0_0] : memref<2x128xbf16, #tpu.memory_space<vmem>>, vector<2x128xbf16>
    %1 = arith.extf %0 : vector<2x128xbf16> to vector<2x128xf32>
    %c0_1 = arith.constant 0 : index
    %c0_2 = arith.constant 0 : index
    %2 = vector.load %arg2[%c0_1, %c0_2] : memref<1x128xf32, #tpu.memory_space<vmem>>, vector<1x128xf32>
    %cst = arith.constant dense<0.000000e+00> : vector<2xf32>
    %3 = vector.multi_reduction <add>, %1, %cst [1] : vector<2x128xf32> to vector<2xf32>
    %4 = vector.shape_cast %3 : vector<2xf32> to vector<2x1xf32>
    %cst_3 = arith.constant 7.812500e-03 : f32
    %5 = vector.broadcast %cst_3 : f32 to vector<2x1xf32>
    %6 = arith.mulf %4, %5 : vector<2x1xf32>
    %7 = arith.mulf %1, %1 : vector<2x128xf32>
    %cst_4 = arith.constant dense<0.000000e+00> : vector<2xf32>
    %8 = vector.multi_reduction <add>, %7, %cst_4 [1] : vector<2x128xf32> to vector<2xf32>
    %9 = vector.shape_cast %8 : vector<2xf32> to vector<2x1xf32>
    %cst_5 = arith.constant 7.812500e-03 : f32
    %10 = vector.broadcast %cst_5 : f32 to vector<2x1xf32>
    %11 = arith.mulf %9, %10 : vector<2x1xf32>
    %12 = vector.broadcast %2 : vector<1x128xf32> to vector<2x128xf32>
    %13 = arith.mulf %1, %12 : vector<2x128xf32>
    %cst_6 = arith.constant dense<0.000000e+00> : vector<2xf32>
    %14 = vector.multi_reduction <add>, %13, %cst_6 [1] : vector<2x128xf32> to vector<2xf32>
    %15 = vector.shape_cast %14 : vector<2xf32> to vector<2x1xf32>
    %16 = arith.mulf %6, %6 : vector<2x1xf32>
    %17 = arith.subf %11, %16 : vector<2x1xf32>
    %cst_7 = arith.constant 0.000000e+00 : f32
    %18 = vector.broadcast %cst_7 : f32 to vector<2x1xf32>
    %19 = arith.maximumf %17, %18 : vector<2x1xf32>
    %cst_8 = arith.constant 9.99999974E-6 : f32
    %20 = vector.broadcast %cst_8 : f32 to vector<2x1xf32>
    %21 = arith.addf %19, %20 : vector<2x1xf32>
    %22 = math.rsqrt %21 : vector<2x1xf32>
    %c0_9 = arith.constant 0 : index
    %23 = memref.load %arg3[%c0_9] : memref<2xf32, #tpu.memory_space<smem>>
    %24 = vector.broadcast %23 : f32 to vector<2x1xf32>
    %25 = arith.mulf %6, %24 : vector<2x1xf32>
    %26 = arith.subf %15, %25 : vector<2x1xf32>
    %27 = arith.mulf %22, %26 : vector<2x1xf32>
    %c1 = arith.constant 1 : index
    %28 = memref.load %arg3[%c1] : memref<2xf32, #tpu.memory_space<smem>>
    %29 = vector.broadcast %28 : f32 to vector<2x1xf32>
    %30 = arith.addf %27, %29 : vector<2x1xf32>
    %31 = tpu.transpose %30, [1, 0] : vector<2x1xf32> -> vector<1x2xf32>
    %32 = vector.shape_cast %31 : vector<1x2xf32> to vector<1x1x2xf32>
    %c0_10 = arith.constant 0 : index
    %c0_11 = arith.constant 0 : index
    %c0_12 = arith.constant 0 : index
    %33 = vector.load %arg4[%c0_10, %c0_11, %c0_12] : memref<1x1x2xf32, #tpu.memory_space<vmem>>, vector<1x1x2xf32>
    tpu.vector_store %arg4[%c0_10, %c0_11, %c0_12], %32 {strides = array<i32>} : memref<1x1x2xf32, #tpu.memory_space<vmem>>, vector<1x1x2xf32>,
    return
  }
  func.func @transform_0(%arg0: i32) -> (i32, i32) {
    %c0_i32 = arith.constant 0 : i32
    %c0_i32_0 = arith.constant 0 : i32
    return %arg0, %c0_i32 : i32, i32
  }
  func.func @transform_1(%arg0: i32) -> (i32, i32) {
    %c0_i32 = arith.constant 0 : i32
    %c0_i32_0 = arith.constant 0 : i32
    %c0_i32_1 = arith.constant 0 : i32
    return %c0_i32, %c0_i32_0 : i32, i32
  }
  func.func @transform_2(%arg0: i32) -> i32 {
    %c0_i32 = arith.constant 0 : i32
    %c0_i32_0 = arith.constant 0 : i32
    return %c0_i32 : i32
  }
  func.func @transform_3(%arg0: i32) -> (i32, i32, i32) {
    %c0_i32 = arith.constant 0 : i32
    %c0_i32_0 = arith.constant 0 : i32
    %c0_i32_1 = arith.constant 0 : i32
    return %arg0, %c0_i32, %c0_i32_0 : i32, i32, i32
  }
}

</mosaic_0001>

<bundles_post_ra>
// kernel: tpu_custom_call.1
= control target key start
LH: loop header
LB: loop body
LE: loop exit
PB: predicated region body
PF: predicated region fallthrough
CT: control target
= control target key end

     0   :  { %8 = vsyncpa [#allocation3], 0  ;;  %s252_s0 = inlined_call_operand.hbm [shape: bf16[2,1024], index: 0, kind: input, shape index: {}]   ;;  %s253_s1 = inlined_call_operand.vmem [shape: f32[1,128], index: 1, kind: input, shape index: {}]   ;;  %s254_s2 = inlined_call_operand.vmem [shape: f32[2], index: 2, kind: input, shape index: {}]   ;;  %s255_s3 = inlined_call_operand.hbm [shape: f32[1,1,2], index: 3, kind: output, shape index: {}]  }
   0x1   :  { %9 = vsyncpa [#allocation5], 0 }
   0x2   :  { %10 = vsyncpa [#allocation4], 0  ;;  %s29_s14 = sshll.u32 %s254_s2, 4  ;;  %s196_s15 = smov [#allocation2]   ;;  %s30_s14 = int_to_ptr.vmem [resolvable:$true] %s29_s14 }
   0x3   :  { %s17_s16 = sshll.u32 %s196_s15, 4  ;;  %s134_s19 = scalar_lea.hbm %s252_s0, 16  ;;  %s18_s16 = int_to_ptr.vmem [resolvable:$true] %s17_s16 }
   0x4   :  { %p135_p0 = scmp.ne.s32.totalorder %s252_s0, %s134_s19  ;;  %s136_s24 = scalar_lea.hbm %s252_s0, 128 }
   0x5   :  { %p137_p1 = scmp.lt.u32.totalorder %s136_s24, %s134_s19  ;;  %p138_p2 = scmp.lt.u32.totalorder %s134_s19, %s252_s0 }
   0x7   :  { %p139_p3 = por %p138_p2, %p137_p1 }
   0x9   :  { %p140_p4 = pnand %p139_p3, %p135_p0 }
   0xb   :  { %143 = shalt.err (!%p140_p4)
}
   0xc   :  { %s144_s2 = scalar_lea.vmem %s18_s16, 16  ;;  %s148_s27 = scalar_lea.vmem %s18_s16, 32 }
   0xd   :  { %p145_p5 = scmp.ne.s32.totalorder %s18_s16, %s144_s2  ;;  %p149_p6 = scmp.lt.s32.totalorder %s18_s16, %s18_s16 }
   0xe   :  { %p150_p7 = scmp.lt.s32.totalorder %s148_s27, %s144_s2 }
  0x10   :  { %p151_p8 = por %p150_p7, %p149_p6 }
  0x12   :  { %p152_p9 = pnand %p151_p8, %p145_p5 }
  0x14   :  { %155 = shalt.err (!%p152_p9)
}
  0x15   :  { %20 = dma.hbm_to_vmem [thread:$0]  %s252_s0, 16, %s18_s16, [#allocation3]  }
  0x16   :  { %s156_s30 = scalar_lea.vmem %s30_s14, 16  ;;  %p161_p11 = scmp.lt.s32.totalorder %s30_s14, %s30_s14 }
  0x17   :  { %p157_p10 = scmp.ne.s32.totalorder %s30_s14, %s156_s30  ;;  %p162_p12 = scmp.lt.s32.totalorder %s156_s30, %s156_s30 }
  0x19   :  { %p163_p13 = por %p162_p12, %p161_p11 }
  0x1b   :  { %p164_p1 = pnand %p163_p13, %p157_p10 }
  0x1d   :  { %167 = shalt.err (!%p164_p1)
}
  0x1e   :  { %s197_s4 = smov [#allocation6]  }
  0x1f   :  { %32 = dma.vmem_to_smem %s30_s14, 16, %s197_s4, [#allocation5]  }
  0x20   :  { %190 = dma.done.wait [#allocation3], 16  }
  0x21   :  { %191 = vsyncadd [#allocation3], 4294967280 }
  0x22   :  { %192 = dma.done.wait [#allocation5], 16  }
  0x23   :  { %193 = vsyncadd [#allocation5], 4294967280 }
  0x24   :  { %39 = sfence }
  0x25   :  { %v40_v0 = vld [vmem:[#allocation2] sm:$0x1]  ;;  %vm43_vm0 = vcmask 1041408   ;;  %s68_s0 = sld [smem:[#allocation6]]  ;;  %s198_s7 = smov [#allocation7]   ;;  %vm108_vm1 = vcmask 8192  }
  0x26   :  { %v126_v1 = vld [vmem:[%s253_s1] ss:$0 sm:$0xff]  ;;  %v41_v2 = vunpack.c.l.bf16 %v40_v0  ;;  %s127_s1 = sld [smem:[#allocation6 + $0x1]]  ;;  %s116_s8 = sshll.u32 %s198_s7, 4  ;;  %s117_s8 = int_to_ptr.vmem [resolvable:$true] %s116_s8 }
  0x27   :  { %s168_s9 = scalar_lea.vmem %s117_s8, 16  ;;  %s172_s10 = scalar_lea.vmem %s117_s8, 32 }
  0x28   :  { %v44_v3 = vsel %vm43_vm0, %v41_v2, 0.0  ;;  %v59_v4 = vmul.f32 %v126_v1, %v41_v2  ;;  %v48_v5 = vmul.f32 %v41_v2, %v41_v2  ;;  %p169_p0 = scmp.ne.s32.totalorder %s117_s8, %s168_s9  ;;  %p173_p2 = scmp.lt.s32.totalorder %s117_s8, %s117_s8 }
  0x29   :  { %45 = vadd.xlane.f32.xlu0 %v44_v3  ;;  %p174_p3 = scmp.lt.s32.totalorder %s172_s10, %s168_s9 }
  0x2a   :  { %v60_v6 = vsel %vm43_vm0, %v59_v4, 0.0  ;;  %v49_v7 = vsel %vm43_vm0, %v48_v5, 0.0 }
  0x2b   :  { %61 = vadd.xlane.f32.xlu1 %v60_v6  ;;  %v69_v16 = vstv %s68_s0  ;;  %p175_p4 = por %p174_p3, %p173_p2 }
  0x2c   :  { %v74_v21 = vstv %s127_s1 }
  0x2d   :  { %50 = vadd.xlane.f32.xlu0 %v49_v7  ;;  %p176_p5 = pnand %p175_p4, %p169_p0 }
  0xb6   :  { %v46_v8 = vpop.xlane.xlu0 %45 }
  0xb7   :  { %v47_v9 = vmul.f32 0.0078125, %v46_v8 }
  0xb8   :  { %v62_v18 = vpop.xlane.xlu1 %61 }
  0xb9   :  { %v63_v11 = vmul.f32 %v47_v9, %v47_v9  ;;  %v70_v17 = vmul.f32 %v69_v16, %v47_v9 }
  0xba   :  { %v51_v10 = vpop.xlane.xlu0 %50 }
  0xbb   :  { %v52_v12 = vmul.f32 0.0078125, %v51_v10  ;;  %v71_v19 = vsub.f32 %v62_v18, %v70_v17 }
  0xbd   :  { %v64_v13 = vsub.f32 %v52_v12, %v63_v11 }
  0xbf   :  { %v65_v14 = vmax.f32 %v64_v13, 0.0 }
  0xc1   :  { %v66_v15 = vadd.f32 1e-05, %v65_v14 }
  0xc3   :  { %132 = vrsqrt.f32 %v66_v15 }
  0xcd   :  { %v133_v20 = vpop.eup %132 }
  0xce   :  { %v72_v22 = vmul.f32 %v133_v20, %v71_v19 }
  0xd0   :  { %v75_v23 = vadd.f32 %v74_v21, %v72_v22 }
  0xd2   :  { %76 = vxpose.xlu1.b32.start.end [1/1] (short) (narrow) %v75_v23, 8 }
 0x152   :  { %v92_v24 = vpop.trf.xlu1 }
 0x153   :  { %109 = vst.msk [vmem:[#allocation7] sm:$0x1] %vm108_vm1, %v92_v24 }
 0x154   :  { %179 = shalt.err (!%p176_p5)
}
 0x155   :  { %s180_s13 = scalar_lea.hbm %s255_s3, 16 }
 0x156   :  { %p181_p6 = scmp.ne.s32.totalorder %s255_s3, %s180_s13  ;;  %p184_p7 = scmp.lt.u32.totalorder %s180_s13, %s255_s3 }
 0x158   :  { %p186_p8 = pnand %p184_p7, %p181_p6 }
 0x15a   :  { %189 = shalt.err (!%p186_p8)
}
 0x15b   :  { %119 = dma.vmem_to_hbm [thread:$0]  %s117_s8, 16, %s255_s3, [#allocation4]  }
 0x15c   :  { %194 = dma.done.wait [#allocation4], 16  }
 0x15d   :  { %195 = vsyncadd [#allocation4], 4294967280 }
 0x15e   :  { %123 = vsyncpa [#allocation3], 1 }
 0x15f   :  { %124 = vsyncpa [#allocation4], 1 }
 0x160   :  { %125 = vsyncpa [#allocation5], 1 }

</bundles_post_ra>
